<compile_context>
chip_gen: v7x
topology: tpu7x:2x2x1
jax: 0.10.0
libtpu: 0.0.40
codegen_flags: <defaults>
</compile_context>

<pallas_src>
import functools

import numpy as np
import jax
import jax.numpy as jnp
from jax.experimental import pallas as pl
from jax.experimental.pallas import tpu as pltpu

LANE = 128
_LN2 = float(np.log(2.0))
# sublane packing per element size (bytes) -> minimum second-to-last multiple
_SUBLANE = {1: 32, 2: 16, 4: 8}


def _focal_loss_kernel(x_ref, t_ref, o_ref, *, tiles_per_par, rows):
    """Accumulates elementwise BCE-with-logits into an (8,128) f32 block.

    Grid = (parallel slice p, reduction step j). The output block index only
    depends on p, so o_ref is resident across j (accumulator pattern).
    """
    p = pl.program_id(0)
    j = pl.program_id(1)
    tile_m = x_ref.shape[0]
    row0 = (p * tiles_per_par + j) * tile_m  # first *logical* row of this tile

    @pl.when(j == 0)
    def _init():
        o_ref[...] = jnp.zeros_like(o_ref)

    # Cast in-kernel (free VPU filler); inputs may be bf16 etc. in HBM.
    x = x_ref[...].astype(jnp.float32)
    t = t_ref[...].astype(jnp.float32)
    # Numerically stable BCE with logits, elementwise (no reduction):
    #   l = max(x, 0) - x*t + log1p(exp(-|x|))
    loss = jnp.maximum(x, 0.0) - x * t + jnp.log1p(jnp.exp(-jnp.abs(x)))

    def _fold(v):  # (tile_m, 128) -> (8, 128) via pure VPU vector adds
        return v.reshape(-1, 8, LANE).sum(axis=0)

    # Steady state: no masking at all.
    @pl.when(row0 + tile_m <= rows)
    def _full_tile():
        o_ref[...] += _fold(loss)

    # Boundary / phantom tiles only: mask rows that lie beyond the real array
    # (out-of-bounds block rows read unspecified data).
    @pl.when(row0 + tile_m > rows)
    def _edge_tile():
        ridx = jax.lax.broadcasted_iota(jnp.int32, loss.shape, 0)
        o_ref[...] += _fold(jnp.where(row0 + ridx < rows, loss, 0.0))


def focal_loss(inputs, targets, *, alpha=1.0, gamma=2.0, tile_rows=4096):
    """Pallas equivalent of FocalLoss(alpha, gamma).forward(inputs, targets)."""
    n = int(inputs.size)
    mult = max(_SUBLANE[jnp.dtype(inputs.dtype).itemsize],
               _SUBLANE[jnp.dtype(targets.dtype).itemsize])
    blk = LANE * mult

    x = inputs.reshape(-1)
    t = targets.reshape(-1)
    # Only pad when the flat length is not lane-aligned (or smaller than one
    # sublane tile). Padded zeros each contribute exactly ln(2) to the sum and
    # are subtracted again in the epilogue — no in-kernel masking needed for
    # them, and for lane-aligned inputs there is no pad copy at all.
    if n % LANE != 0 or n < blk:
        n_pad = ((n + blk - 1) // blk) * blk
        x = jnp.pad(x, (0, n_pad - n))
        t = jnp.pad(t, (0, n_pad - n))
    else:
        n_pad = n
    rows = n_pad // LANE
    x = x.reshape(rows, LANE)
    t = t.reshape(rows, LANE)

    # ~2 MiB (f32) blocks by default; sweep tile_rows per generation if needed.
    tile_m = min((int(tile_rows) // mult) * mult, (rows // mult) * mult)
    tile_m = max(tile_m, mult)
    n_tiles = pl.cdiv(rows, tile_m)

    # v7x has 2 TensorCores: shard the reduction over a leading 'parallel'
    # axis. On single-core v5e/v6e this is just a harmless outer loop (the at
    # most one phantom tile repeats a block index, so its DMA is skipped).
    npar = 2 if n_tiles >= 2 else 1
    tiles_per_par = pl.cdiv(n_tiles, npar)

    def in_imap(p, j):
        g = p * tiles_per_par + j
        # Phantom tiles (npar not dividing n_tiles) re-use the last real block
        # index; their contribution is fully masked in the kernel.
        return (jnp.minimum(g, n_tiles - 1), 0)

    kernel = functools.partial(
        _focal_loss_kernel, tiles_per_par=tiles_per_par, rows=rows
    )

    # TODO(synk): if profiling shows exposed DMA, add pipeline_mode=pl.Buffered(3)
    # on the input BlockSpecs (re-check per-generation VMEM budget first).
    partials = pl.pallas_call(
        kernel,
        out_shape=jax.ShapeDtypeStruct((npar * 8, LANE), jnp.float32),
        grid=(npar, tiles_per_par),
        in_specs=[
            pl.BlockSpec((tile_m, LANE), in_imap),
            pl.BlockSpec((tile_m, LANE), in_imap),
        ],
        out_specs=pl.BlockSpec((8, LANE), lambda p, j: (p, 0)),
        compiler_params=pltpu.CompilerParams(
            dimension_semantics=("parallel", "arbitrary"),
            vmem_limit_bytes=32 << 20,
        ),
    )(x, t)

    # Tiny scalar epilogue: undo ln(2) from lane-padding zeros, take the mean,
    # apply the focal transform (matches the PyTorch module: focal weight on
    # the *mean* BCE, as in the reference snippet).
    total = jnp.sum(partials) - jnp.float32(n_pad - n) * jnp.float32(_LN2)
    bce = total / jnp.float32(n)
    pt = jnp.exp(-bce)
    return jnp.float32(alpha) * (1.0 - pt) ** jnp.float32(gamma) * bce


def _focal_loss_ref(inputs, targets, alpha=1.0, gamma=2.0):
    x = inputs.astype(jnp.float32)
    t = targets.astype(jnp.float32)
    loss = jnp.maximum(x, 0.0) - x * t + jnp.log1p(jnp.exp(-jnp.abs(x)))
    bce = jnp.mean(loss)
    pt = jnp.exp(-bce)
    return alpha * (1.0 - pt) ** gamma * bce


if __name__ == "__main__":
    key = jax.random.PRNGKey(0)
    k1, k2 = jax.random.split(key)
    # NCHW, small shapes: batch=2, channels=4, spatial=16x16
    x = jax.random.normal(k1, (2, 4, 16, 16), dtype=jnp.float32)
    targets = jax.random.bernoulli(k2, 0.5, (2, 4, 16, 16)).astype(jnp.float32)

    out = focal_loss(x, targets, alpha=1.0, gamma=2.0)
    out = jax.block_until_ready(out)

    ref = _focal_loss_ref(x, targets, alpha=1.0, gamma=2.0)
    assert jnp.allclose(out, ref, rtol=1e-5, atol=1e-6), (out, ref)

    print("KERNEL_OK")
</pallas_src>

<mosaic_0001>
module attributes {stable_mosaic.version = 11 : i64} {
  func.func @_focal_loss_kernel(%arg0: i32, %arg1: i32, %arg2: memref<16x128xf32, #tpu.memory_space<vmem>>, %arg3: memref<16x128xf32, #tpu.memory_space<vmem>>, %arg4: memref<8x128xf32, #tpu.memory_space<vmem>>) attributes {dimension_semantics = [#tpu.dimension_semantics<parallel>, #tpu.dimension_semantics<arbitrary>], iteration_bounds = array<i64: 1, 1>, scalar_prefetch = 0 : i64, scratch_operands = 0 : i64, tpu.core_type = #tpu.core_type<tc>, window_params = [{transform_indices = @transform_0, window_bounds = array<i64: 16, 128>}, {transform_indices = @transform_1, window_bounds = array<i64: 16, 128>}, {transform_indices = @transform_2, window_bounds = array<i64: 8, 128>}]} {
    %c1_i32 = arith.constant 1 : i32
    %0 = arith.muli %arg0, %c1_i32 : i32
    %1 = arith.addi %0, %arg1 : i32
    %c16_i32 = arith.constant 16 : i32
    %2 = arith.muli %1, %c16_i32 : i32
    %c0_i32 = arith.constant 0 : i32
    %3 = arith.cmpi eq, %arg1, %c0_i32 : i32
    %4 = arith.extui %3 : i1 to i32
    %c0_i32_0 = arith.constant 0 : i32
    %5 = arith.cmpi ne, %4, %c0_i32_0 : i32
    scf.if %5 {
      %cst_11 = arith.constant 0.000000e+00 : f32
      %26 = vector.broadcast %cst_11 : f32 to vector<8x128xf32>
      %c0_12 = arith.constant 0 : index
      %c0_13 = arith.constant 0 : index
      %27 = vector.load %arg4[%c0_12, %c0_13] : memref<8x128xf32, #tpu.memory_space<vmem>>, vector<8x128xf32>
      tpu.vector_store %arg4[%c0_12, %c0_13], %26 {strides = array<i32>} : memref<8x128xf32, #tpu.memory_space<vmem>>, vector<8x128xf32>,
    } else {
    }
    %c0 = arith.constant 0 : index
    %c0_1 = arith.constant 0 : index
    %6 = vector.load %arg2[%c0, %c0_1] : memref<16x128xf32, #tpu.memory_space<vmem>>, vector<16x128xf32>
    %c0_2 = arith.constant 0 : index
    %c0_3 = arith.constant 0 : index
    %7 = vector.load %arg3[%c0_2, %c0_3] : memref<16x128xf32, #tpu.memory_space<vmem>>, vector<16x128xf32>
    %cst = arith.constant 0.000000e+00 : f32
    %8 = vector.broadcast %cst : f32 to vector<16x128xf32>
    %9 = arith.maximumf %6, %8 : vector<16x128xf32>
    %10 = arith.mulf %6, %7 : vector<16x128xf32>
    %11 = arith.subf %9, %10 : vector<16x128xf32>
    %12 = math.absf %6 : vector<16x128xf32>
    %cst_4 = arith.constant 0.000000e+00 : f32
    %13 = vector.broadcast %cst_4 : f32 to vector<16x128xf32>
    %14 = arith.subf %13, %12 : vector<16x128xf32>
    %15 = math.exp %14 : vector<16x128xf32>
    %16 = math.log1p %15 : vector<16x128xf32>
    %17 = arith.addf %11, %16 : vector<16x128xf32>
    %c16_i32_5 = arith.constant 16 : i32
    %18 = arith.addi %2, %c16_i32_5 : i32
    %c16_i32_6 = arith.constant 16 : i32
    %19 = arith.cmpi sle, %18, %c16_i32_6 : i32
    %20 = arith.extui %19 : i1 to i32
    %c0_i32_7 = arith.constant 0 : i32
    %21 = arith.cmpi ne, %20, %c0_i32_7 : i32
    scf.if %21 {
      %c0_11 = arith.constant 0 : index
      %c0_12 = arith.constant 0 : index
      %26 = vector.load %arg4[%c0_11, %c0_12] : memref<8x128xf32, #tpu.memory_space<vmem>>, vector<8x128xf32>
      %27 = vector.shape_cast %17 : vector<16x128xf32> to vector<2x8x128xf32>
      %cst_13 = arith.constant dense<0.000000e+00> : vector<8x128xf32>
      %28 = vector.multi_reduction <add>, %27, %cst_13 [0] : vector<2x8x128xf32> to vector<8x128xf32>
      %29 = arith.addf %26, %28 : vector<8x128xf32>
      %c0_14 = arith.constant 0 : index
      %c0_15 = arith.constant 0 : index
      %30 = vector.load %arg4[%c0_14, %c0_15] : memref<8x128xf32, #tpu.memory_space<vmem>>, vector<8x128xf32>
      tpu.vector_store %arg4[%c0_14, %c0_15], %29 {strides = array<i32>} : memref<8x128xf32, #tpu.memory_space<vmem>>, vector<8x128xf32>,
    } else {
    }
    %c16_i32_8 = arith.constant 16 : i32
    %22 = arith.addi %2, %c16_i32_8 : i32
    %c16_i32_9 = arith.constant 16 : i32
    %23 = arith.cmpi sgt, %22, %c16_i32_9 : i32
    %24 = arith.extui %23 : i1 to i32
    %c0_i32_10 = arith.constant 0 : i32
    %25 = arith.cmpi ne, %24, %c0_i32_10 : i32
    scf.if %25 {
      %26 = tpu.iota {dimensions = array<i32: 0>} : vector<16x128xi32>
      %c0_11 = arith.constant 0 : index
      %c0_12 = arith.constant 0 : index
      %27 = vector.load %arg4[%c0_11, %c0_12] : memref<8x128xf32, #tpu.memory_space<vmem>>, vector<8x128xf32>
      %28 = vector.broadcast %2 : i32 to vector<16x128xi32>
      %29 = arith.addi %28, %26 : vector<16x128xi32>
      %c16_i32_13 = arith.constant 16 : i32
      %30 = vector.broadcast %c16_i32_13 : i32 to vector<16x128xi32>
      %31 = arith.cmpi slt, %29, %30 : vector<16x128xi32>
      %cst_14 = arith.constant 0.000000e+00 : f32
      %32 = vector.broadcast %cst_14 : f32 to vector<16x128xf32>
      %33 = arith.select %31, %17, %32 : vector<16x128xi1>, vector<16x128xf32>
      %34 = vector.shape_cast %33 : vector<16x128xf32> to vector<2x8x128xf32>
      %cst_15 = arith.constant dense<0.000000e+00> : vector<8x128xf32>
      %35 = vector.multi_reduction <add>, %34, %cst_15 [0] : vector<2x8x128xf32> to vector<8x128xf32>
      %36 = arith.addf %27, %35 : vector<8x128xf32>
      %c0_16 = arith.constant 0 : index
      %c0_17 = arith.constant 0 : index
      %37 = vector.load %arg4[%c0_16, %c0_17] : memref<8x128xf32, #tpu.memory_space<vmem>>, vector<8x128xf32>
      tpu.vector_store %arg4[%c0_16, %c0_17], %36 {strides = array<i32>} : memref<8x128xf32, #tpu.memory_space<vmem>>, vector<8x128xf32>,
    } else {
    }
    return
  }
  func.func @transform_0(%arg0: i32, %arg1: i32) -> (i32, i32) {
    %c1_i32 = arith.constant 1 : i32
    %0 = arith.muli %arg0, %c1_i32 : i32
    %1 = arith.addi %0, %arg1 : i32
    %c0_i32 = arith.constant 0 : i32
    %2 = arith.minsi %1, %c0_i32 : i32
    %c0_i32_0 = arith.constant 0 : i32
    %c0_i32_1 = arith.constant 0 : i32
    return %2, %c0_i32_0 : i32, i32
  }
  func.func @transform_1(%arg0: i32, %arg1: i32) -> (i32, i32) {
    %c1_i32 = arith.constant 1 : i32
    %0 = arith.muli %arg0, %c1_i32 : i32
    %1 = arith.addi %0, %arg1 : i32
    %c0_i32 = arith.constant 0 : i32
    %2 = arith.minsi %1, %c0_i32 : i32
    %c0_i32_0 = arith.constant 0 : i32
    %c0_i32_1 = arith.constant 0 : i32
    return %2, %c0_i32_0 : i32, i32
  }
  func.func @transform_2(%arg0: i32, %arg1: i32) -> (i32, i32) {
    %c0_i32 = arith.constant 0 : i32
    %c0_i32_0 = arith.constant 0 : i32
    return %arg0, %c0_i32 : i32, i32
  }
}

</mosaic_0001>

<bundles_post_ra>
// kernel: tpu_custom_call.1
= control target key start
LH: loop header
LB: loop body
LE: loop exit
PB: predicated region body
PF: predicated region fallthrough
CT: control target
= control target key end

     0   :  { %7 = vsyncpa [#allocation3], 0  ;;  %s294_s0 = inlined_call_operand.hbm [shape: f32[16,128], index: 0, kind: input, shape index: {}]   ;;  %s295_s1 = inlined_call_operand.hbm [shape: f32[16,128], index: 1, kind: input, shape index: {}]   ;;  %s296_s2 = inlined_call_operand.hbm [shape: f32[8,128], index: 2, kind: output, shape index: {}]  }
   0x1   :  { %8 = vsyncpa [#allocation6], 0 }
   0x2   :  { %9 = vsyncpa [#allocation4], 0  ;;  %s238_s9 = smov [#allocation2]   ;;  %s166_s13 = scalar_lea.hbm %s294_s0, 256 }
   0x3   :  { %s21_s10 = sshll.u32 %s238_s9, 4  ;;  %p167_p0 = scmp.ne.s32.totalorder %s294_s0, %s166_s13  ;;  %s22_s10 = int_to_ptr.vmem [resolvable:$true] %s21_s10 }
   0x4   :  { %p170_p1 = scmp.lt.u32.totalorder %s166_s13, %s294_s0 }
   0x6   :  { %p172_p2 = pnand %p170_p1, %p167_p0 }
   0x8   :  { %175 = shalt.err (!%p172_p2)
}
   0x9   :  { %s176_s18 = scalar_lea.vmem %s22_s10, 256  ;;  %p181_p4 = scmp.lt.s32.totalorder %s22_s10, %s22_s10 }
   0xa   :  { %p177_p3 = scmp.ne.s32.totalorder %s22_s10, %s176_s18  ;;  %p182_p5 = scmp.lt.s32.totalorder %s176_s18, %s176_s18 }
   0xc   :  { %p183_p6 = por %p182_p5, %p181_p4 }
   0xe   :  { %p184_p7 = pnand %p183_p6, %p177_p3 }
  0x10   :  { %187 = shalt.err (!%p184_p7)
}
  0x11   :  { %s239_s19 = smov 128   ;;  %s240_s20 = smov 8  }
  0x12   :  { %27 = dma.hbm_to_vmem [thread:$0]  %s294_s0, 256, %s22_s10, [#allocation3], %s239_s19, %s239_s19, %s240_s20  }
  0x13   :  { %s241_s23 = smov [#allocation5]   ;;  %s188_s27 = scalar_lea.hbm %s295_s1, 256 }
  0x14   :  { %s39_s24 = sshll.u32 %s241_s23, 4  ;;  %p189_p8 = scmp.ne.s32.totalorder %s295_s1, %s188_s27  ;;  %s40_s24 = int_to_ptr.vmem [resolvable:$true] %s39_s24 }
  0x15   :  { %p192_p9 = scmp.lt.u32.totalorder %s188_s27, %s295_s1 }
  0x17   :  { %p194_p10 = pnand %p192_p9, %p189_p8 }
  0x19   :  { %197 = shalt.err (!%p194_p10)
}
  0x1a   :  { %s198_s4 = scalar_lea.vmem %s40_s24, 256  ;;  %p203_p12 = scmp.lt.s32.totalorder %s40_s24, %s40_s24 }
  0x1b   :  { %p199_p11 = scmp.ne.s32.totalorder %s40_s24, %s198_s4  ;;  %p204_p13 = scmp.lt.s32.totalorder %s198_s4, %s198_s4 }
  0x1d   :  { %p205_p0 = por %p204_p13, %p203_p12 }
  0x1f   :  { %p206_p1 = pnand %p205_p0, %p199_p11 }
  0x21   :  { %209 = shalt.err (!%p206_p1)
}
  0x22   :  { %45 = dma.hbm_to_vmem [thread:$0]  %s295_s1, 256, %s40_s24, [#allocation6], %s239_s19, %s239_s19, %s240_s20  }
  0x23   :  { %232 = dma.done.wait [#allocation3], 256  }
  0x24   :  { %233 = vsyncadd [#allocation3], 4294967040 }
  0x25   :  { %234 = dma.done.wait [#allocation6], 256  }
  0x26   :  { %235 = vsyncadd [#allocation6], 4294967040  ;;  %v67_v0 = vld [vmem:[#allocation2] sm:$0xff]  ;;  %v68_v1 = vld [vmem:[#allocation2 + $0x8] sm:$0xff]  ;;  %s242_s1 = smov [#allocation7]  }
  0x27   :  { %v77_v2 = vand.u32 2147483647, %v67_v0  ;;  %v78_v3 = vand.u32 2147483647, %v68_v1  ;;  %v69_v14 = vld [vmem:[#allocation5] sm:$0xff]  ;;  %v70_v15 = vld [vmem:[#allocation5 + $0x8] sm:$0xff] }
  0x28   :  { %v71_v17 = vmax.f32 %v67_v0, 0.0  ;;  %v73_v18 = vmul.f32 %v69_v14, %v67_v0  ;;  %v72_v21 = vmax.f32 %v68_v1, 0.0  ;;  %v74_v22 = vmul.f32 %v70_v15, %v68_v1  ;;  %s138_s6 = sshll.u32 %s242_s1, 4  ;;  %s139_s6 = int_to_ptr.vmem [resolvable:$true] %s138_s6 }
  0x29   :  { %v79_v4 = vsub.f32 0.0, %v77_v2  ;;  %v80_v5 = vsub.f32 0.0, %v78_v3  ;;  %s210_s7 = scalar_lea.vmem %s139_s6, 128  ;;  %p215_p3 = scmp.lt.s32.totalorder %s139_s6, %s139_s6 }
  0x2a   :  { %v75_v26 = vsub.f32 %v71_v17, %v73_v18  ;;  %v76_v29 = vsub.f32 %v72_v21, %v74_v22  ;;  %p211_p2 = scmp.ne.s32.totalorder %s139_s6, %s210_s7  ;;  %p216_p4 = scmp.lt.s32.totalorder %s210_s7, %s210_s7 }
  0x2b   :  { %v81_v6 = vmul.f32 1.442695, %v79_v4  ;;  %v83_v7 = vmul.f32 1.442695, %v80_v5 }
  0x2c   :  { %p217_p5 = por %p216_p4, %p215_p3 }
  0x2d   :  { %158 = vpow2.f32 %v81_v6 }
  0x2e   :  { %160 = vpow2.f32 %v83_v7  ;;  %p218_p6 = pnand %p217_p5, %p211_p2 }
  0x37   :  { %v159_v8 = vpop.eup %158 }
  0x38   :  { %v161_v9 = vpop.eup %160  ;;  %v85_v10 = vadd.f32 1.0, %v159_v8  ;;  %v88_v12 = vmul.f32 -0.5, %v159_v8  ;;  %v91_v19 = vand.u32 2147483647, %v159_v8 }
  0x39   :  { %v94_v11 = vadd.f32 1.0, %v161_v9  ;;  %v97_v13 = vmul.f32 -0.5, %v161_v9  ;;  %v100_v23 = vand.u32 2147483647, %v161_v9 }
  0x3a   :  { %162 = vlog2.f32 %v85_v10  ;;  %v89_v16 = vadd.f32 1.0, %v88_v12  ;;  %vm92_vm0 = vcmp.lt.f32.partialorder %v91_v19, 0.0004427343 }
  0x3b   :  { %164 = vlog2.f32 %v94_v11  ;;  %v98_v20 = vadd.f32 1.0, %v97_v13  ;;  %vm101_vm1 = vcmp.lt.f32.partialorder %v100_v23, 0.0004427343 }
  0x3c   :  { %v90_v24 = vmul.f32 %v159_v8, %v89_v16 }
  0x3d   :  { %v99_v27 = vmul.f32 %v161_v9, %v98_v20 }
  0x44   :  { %v163_v25 = vpop.eup %162 }
  0x45   :  { %v165_v28 = vpop.eup %164  ;;  %v87_v30 = vmul.f32 0.6931472, %v163_v25 }
  0x46   :  { %v96_v31 = vmul.f32 0.6931472, %v165_v28 }
  0x47   :  { %v93_v32 = vsel %vm92_vm0, %v90_v24, %v87_v30 }
  0x48   :  { %v102_v33 = vsel %vm101_vm1, %v99_v27, %v96_v31  ;;  %v103_v34 = vadd.f32 %v93_v32, %v75_v26 }
  0x49   :  { %v104_v35 = vadd.f32 %v102_v33, %v76_v29 }
  0x4b   :  { %v111_v36 = vadd.f32 %v104_v35, %v103_v34 }
  0x4d   :  { %113 = vst [vmem:[#allocation7] sm:$0xff] %v111_v36 }
  0x4e   :  { %221 = shalt.err (!%p218_p6)
}
  0x4f   :  { %s222_s10 = scalar_lea.hbm %s296_s2, 128 }
  0x50   :  { %p223_p7 = scmp.ne.s32.totalorder %s296_s2, %s222_s10  ;;  %p226_p8 = scmp.lt.u32.totalorder %s222_s10, %s296_s2 }
  0x52   :  { %p228_p9 = pnand %p226_p8, %p223_p7 }
  0x54   :  { %231 = shalt.err (!%p228_p9)
}
  0x55   :  { %141 = dma.vmem_to_hbm [thread:$0]  %s139_s6, 128, %s296_s2, [#allocation4]  }
  0x56   :  { %236 = dma.done.wait [#allocation4], 128  }
  0x57   :  { %237 = vsyncadd [#allocation4], 4294967168 }
  0x58   :  { %145 = vsyncpa [#allocation3], 1 }
  0x59   :  { %146 = vsyncpa [#allocation6], 1 }
  0x5a   :  { %147 = vsyncpa [#allocation4], 1 }

</bundles_post_ra>
